<compile_context>
chip_gen: v7x
topology: tpu7x:2x2x1
jax: 0.10.0
libtpu: 0.0.40
codegen_flags: <defaults>
</compile_context>

<pallas_src>
import jax
import jax.numpy as jnp
from jax.experimental import pallas as pl
from jax.experimental.pallas import tpu as pltpu


def _round_up(a, b):
    return (a + b - 1) // b * b


def ffwd_kernel(x_ref, w1_ref, b1_ref, w2_ref, b2_ref, o_ref):
    # x_ref : (tm, Cp) bf16     w1_ref: (Cp, th) bf16    b1_ref: (1, th) f32
    # w2_ref: (th, Cp) bf16     b2_ref: (1, Cp) f32      o_ref : (tm, Cp) f32
    #
    # Grid = (row tiles i : parallel, hidden chunks k : reduction).
    # o_ref's block index is (i, 0) for every k, so the output tile stays
    # resident in VMEM across the H reduction -> accumulate directly into it.
    k = pl.program_id(1)

    @pl.when(k == 0)
    def _():
        # Seed the resident output tile with the second-layer bias.
        o_ref[...] = jnp.broadcast_to(b2_ref[...], o_ref.shape).astype(o_ref.dtype)

    # First matmul chunk + bias + ReLU (f32 accumulation on the MXU / VPU).
    h = jnp.dot(x_ref[...], w1_ref[...], preferred_element_type=jnp.float32)
    h = jnp.maximum(h + b1_ref[...], 0.0)

    # Second matmul chunk, accumulated into the resident f32 output tile.
    o_ref[...] += jnp.dot(h.astype(w2_ref.dtype), w2_ref[...],
                          preferred_element_type=jnp.float32)
    # Dropout (eval mode) = identity -> nothing else to do at the last k.


def prepare_ffwd_params(w1, b1, w2, b2, *, th=512):
    """One-time parameter prep: pad to (128/th)-aligned shapes and cast to bf16.

    Do this once (e.g. at load time / under jit with constant folding), NOT per
    forward call, so the kernel reads weights straight from their final HBM
    layout.
    """
    C, H = w1.shape
    assert w2.shape == (H, C), "w2 must be (H, C)"
    th = max(128, min(_round_up(th, 128), _round_up(H, 128)))
    Cp = _round_up(C, 128)
    Hp = _round_up(H, th)

    w1p = jnp.pad(w1, ((0, Cp - C), (0, Hp - H))).astype(jnp.bfloat16)
    b1p = jnp.pad(b1.reshape(1, H), ((0, 0), (0, Hp - H))).astype(jnp.float32)
    w2p = jnp.pad(w2, ((0, Hp - H), (0, Cp - C))).astype(jnp.bfloat16)
    b2p = jnp.pad(b2.reshape(1, C), ((0, 0), (0, Cp - C))).astype(jnp.float32)

    return {"w1": w1p, "b1": b1p, "w2": w2p, "b2": b2p,
            "C": C, "H": H, "Cp": Cp, "Hp": Hp, "th": th}


def feedforward(x, params, *, tm=512):
    """x: (B, T, C) f32; params: output of prepare_ffwd_params.

    Computes relu(x @ W1 + b1) @ W2 + b2 (eval-mode dropout = identity),
    bf16 inputs/weights on the MXU with f32 accumulation.
    """
    B, T, C = x.shape
    assert C == params["C"]
    Cp, Hp, th = params["Cp"], params["Hp"], params["th"]
    M = B * T

    # --- row-tile selection ------------------------------------------------
    # 16-aligned (bf16 sublane packing).  For small M, split into (up to) two
    # row tiles so the "parallel" axis can shard across v7x's 2 TensorCores;
    # for large M use the requested tm (512 default; raise to ~1024 on v6e for
    # very large M to clear its ~650 FLOP/byte ridge).
    tm = _round_up(max(tm, 16), 16)
    M16 = _round_up(M, 16)
    if M16 <= tm:
        tm = max(16, _round_up(-(-M16 // 2), 16))
    Mp = _round_up(M, tm)

    # --- pad activations (zeros -> exact results after slicing) -------------
    x2d = x.reshape(M, C)
    x2d = jnp.pad(x2d, ((0, Mp - M), (0, Cp - C))).astype(jnp.bfloat16)

    grid = (Mp // tm, Hp // th)  # (row tiles: parallel, hidden chunks: reduction)
    n_row_tiles = grid[0]

    cost = pl.CostEstimate(
        flops=2 * Mp * Cp * Hp + 2 * Mp * Hp * Cp,
        transcendentals=0,
        bytes_accessed=(Mp * Cp * 2                       # x (bf16)
                        + n_row_tiles * (Cp * Hp * 2      # W1 re-streamed per row tile
                                         + Hp * 4         # b1
                                         + Hp * Cp * 2    # W2 re-streamed per row tile
                                         + Cp * 4)        # b2
                        + Mp * Cp * 4),                   # out (f32)
    )

    out2d = pl.pallas_call(
        ffwd_kernel,
        out_shape=jax.ShapeDtypeStruct((Mp, Cp), jnp.float32),
        grid_spec=pltpu.PrefetchScalarGridSpec(
            num_scalar_prefetch=0,
            grid=grid,
            in_specs=[
                pl.BlockSpec((tm, Cp), lambda i, k: (i, 0)),   # x row tile
                pl.BlockSpec((Cp, th), lambda i, k: (0, k)),   # W1 hidden chunk
                pl.BlockSpec((1, th), lambda i, k: (0, k)),    # b1 chunk
                pl.BlockSpec((th, Cp), lambda i, k: (k, 0)),   # W2 hidden chunk
                pl.BlockSpec((1, Cp), lambda i, k: (0, 0)),    # b2 (grid-constant)
            ],
            out_specs=pl.BlockSpec((tm, Cp), lambda i, k: (i, 0)),  # resident over k
        ),
        compiler_params=pltpu.CompilerParams(
            dimension_semantics=("parallel", "arbitrary"),
            vmem_limit_bytes=48 * 1024 * 1024,
        ),
        cost_estimate=cost,
    )(x2d, params["w1"], params["b1"], params["w2"], params["b2"])

    return out2d[:M, :C].reshape(B, T, C)


if __name__ == "__main__":
    # Small shapes consistent with the module: n_embd = 384, hidden = 4 * n_embd.
    B, T, n_embd = 2, 8, 384
    hidden = 4 * n_embd

    key = jax.random.PRNGKey(0)
    kx, kw1, kb1, kw2, kb2 = jax.random.split(key, 5)

    x = jax.random.normal(kx, (B, T, n_embd), dtype=jnp.float32)

    # Deterministic parameter init (nn.Linear-style uniform bounds).
    bound1 = 1.0 / (n_embd ** 0.5)
    w1 = jax.random.uniform(kw1, (n_embd, hidden), jnp.float32, -bound1, bound1)
    b1 = jax.random.uniform(kb1, (1, hidden), jnp.float32, -bound1, bound1)
    bound2 = 1.0 / (hidden ** 0.5)
    w2 = jax.random.uniform(kw2, (hidden, n_embd), jnp.float32, -bound2, bound2)
    b2 = jax.random.uniform(kb2, (1, n_embd), jnp.float32, -bound2, bound2)

    # One-time parameter prep (padded + bf16), then the per-call kernel.
    params = prepare_ffwd_params(w1, b1, w2, b2, th=512)
    y = feedforward(x, params)
    jax.block_until_ready(y)

    # Pure-JAX reference with the same bf16-input / f32-accumulate numerics.
    xb = x.reshape(-1, n_embd).astype(jnp.bfloat16)
    h = jnp.dot(xb, w1.astype(jnp.bfloat16), preferred_element_type=jnp.float32) + b1
    h = jnp.maximum(h, 0.0)
    ref = jnp.dot(h.astype(jnp.bfloat16), w2.astype(jnp.bfloat16),
                  preferred_element_type=jnp.float32) + b2
    ref = ref.reshape(B, T, n_embd)
    assert jnp.allclose(y, ref, atol=2e-2, rtol=2e-2), "mismatch vs reference"

    print("KERNEL_OK")
</pallas_src>

<mosaic_0001>
module attributes {stable_mosaic.version = 11 : i64} {
  func.func @ffwd_kernel(%arg0: i32, %arg1: i32, %arg2: memref<16x384xbf16, #tpu.memory_space<vmem>>, %arg3: memref<384x512xbf16, #tpu.memory_space<vmem>>, %arg4: memref<1x512xf32, #tpu.memory_space<vmem>>, %arg5: memref<512x384xbf16, #tpu.memory_space<vmem>>, %arg6: memref<1x384xf32, #tpu.memory_space<vmem>>, %arg7: memref<16x384xf32, #tpu.memory_space<vmem>>) attributes {dimension_semantics = [#tpu.dimension_semantics<parallel>, #tpu.dimension_semantics<arbitrary>], iteration_bounds = array<i64: 1, 3>, scalar_prefetch = 0 : i64, scratch_operands = 0 : i64, tpu.core_type = #tpu.core_type<tc>, window_params = [{transform_indices = @transform_0, window_bounds = array<i64: 16, 384>}, {transform_indices = @transform_1, window_bounds = array<i64: 384, 512>}, {transform_indices = @transform_2, window_bounds = array<i64: 1, 512>}, {transform_indices = @transform_3, window_bounds = array<i64: 512, 384>}, {pipeline_mode = #tpu.pipeline_mode<synchronous>, transform_indices = @transform_4, window_bounds = array<i64: 1, 384>}, {transform_indices = @transform_5, window_bounds = array<i64: 16, 384>}]} {
    %c0_i32 = arith.constant 0 : i32
    %0 = arith.cmpi eq, %arg1, %c0_i32 : i32
    %1 = arith.extui %0 : i1 to i32
    %c0_i32_0 = arith.constant 0 : i32
    %2 = arith.cmpi ne, %1, %c0_i32_0 : i32
    scf.if %2 {
      %c0_14 = arith.constant 0 : index
      %c0_15 = arith.constant 0 : index
      %17 = vector.load %arg6[%c0_14, %c0_15] : memref<1x384xf32, #tpu.memory_space<vmem>>, vector<1x384xf32>
      %18 = vector.shape_cast %17 : vector<1x384xf32> to vector<1x384xf32>
      %19 = vector.broadcast %18 : vector<1x384xf32> to vector<16x384xf32>
      %c0_16 = arith.constant 0 : index
      %c0_17 = arith.constant 0 : index
      %20 = vector.load %arg7[%c0_16, %c0_17] : memref<16x384xf32, #tpu.memory_space<vmem>>, vector<16x384xf32>
      tpu.vector_store %arg7[%c0_16, %c0_17], %19 {strides = array<i32>} : memref<16x384xf32, #tpu.memory_space<vmem>>, vector<16x384xf32>,
    } else {
    }
    %c0 = arith.constant 0 : index
    %c0_1 = arith.constant 0 : index
    %3 = vector.load %arg2[%c0, %c0_1] : memref<16x384xbf16, #tpu.memory_space<vmem>>, vector<16x384xbf16>
    %c0_2 = arith.constant 0 : index
    %c0_3 = arith.constant 0 : index
    %4 = vector.load %arg3[%c0_2, %c0_3] : memref<384x512xbf16, #tpu.memory_space<vmem>>, vector<384x512xbf16>
    %cst = arith.constant dense<0.000000e+00> : vector<16x512xf32>
    %5 = tpu.matmul %3, %4, %cst {dimension_numbers = #tpu.dot_dimension_numbers<[1], [0], [0], [1], [0, 0, 1, 1], [], []>} : vector<16x384xbf16>, vector<384x512xbf16>, vector<16x512xf32> -> vector<16x512xf32>
    %c0_4 = arith.constant 0 : index
    %c0_5 = arith.constant 0 : index
    %6 = vector.load %arg4[%c0_4, %c0_5] : memref<1x512xf32, #tpu.memory_space<vmem>>, vector<1x512xf32>
    %7 = vector.broadcast %6 : vector<1x512xf32> to vector<16x512xf32>
    %8 = arith.addf %5, %7 : vector<16x512xf32>
    %cst_6 = arith.constant 0.000000e+00 : f32
    %9 = vector.broadcast %cst_6 : f32 to vector<16x512xf32>
    %10 = arith.maximumf %8, %9 : vector<16x512xf32>
    %c0_7 = arith.constant 0 : index
    %c0_8 = arith.constant 0 : index
    %11 = vector.load %arg7[%c0_7, %c0_8] : memref<16x384xf32, #tpu.memory_space<vmem>>, vector<16x384xf32>
    %12 = arith.truncf %10 : vector<16x512xf32> to vector<16x512xbf16>
    %c0_9 = arith.constant 0 : index
    %c0_10 = arith.constant 0 : index
    %13 = vector.load %arg5[%c0_9, %c0_10] : memref<512x384xbf16, #tpu.memory_space<vmem>>, vector<512x384xbf16>
    %cst_11 = arith.constant dense<0.000000e+00> : vector<16x384xf32>
    %14 = tpu.matmul %12, %13, %cst_11 {dimension_numbers = #tpu.dot_dimension_numbers<[1], [0], [0], [1], [0, 0, 1, 1], [], []>} : vector<16x512xbf16>, vector<512x384xbf16>, vector<16x384xf32> -> vector<16x384xf32>
    %15 = arith.addf %11, %14 : vector<16x384xf32>
    %c0_12 = arith.constant 0 : index
    %c0_13 = arith.constant 0 : index
    %16 = vector.load %arg7[%c0_12, %c0_13] : memref<16x384xf32, #tpu.memory_space<vmem>>, vector<16x384xf32>
    tpu.vector_store %arg7[%c0_12, %c0_13], %15 {strides = array<i32>} : memref<16x384xf32, #tpu.memory_space<vmem>>, vector<16x384xf32>,
    return
  }
  func.func @transform_0(%arg0: i32, %arg1: i32) -> (i32, i32) {
    %c0_i32 = arith.constant 0 : i32
    %c0_i32_0 = arith.constant 0 : i32
    return %arg0, %c0_i32 : i32, i32
  }
  func.func @transform_1(%arg0: i32, %arg1: i32) -> (i32, i32) {
    %c0_i32 = arith.constant 0 : i32
    %c0_i32_0 = arith.constant 0 : i32
    return %c0_i32, %arg1 : i32, i32
  }
  func.func @transform_2(%arg0: i32, %arg1: i32) -> (i32, i32) {
    %c0_i32 = arith.constant 0 : i32
    %c0_i32_0 = arith.constant 0 : i32
    return %c0_i32, %arg1 : i32, i32
  }
  func.func @transform_3(%arg0: i32, %arg1: i32) -> (i32, i32) {
    %c0_i32 = arith.constant 0 : i32
    %c0_i32_0 = arith.constant 0 : i32
    return %arg1, %c0_i32 : i32, i32
  }
  func.func @transform_4(%arg0: i32, %arg1: i32) -> (i32, i32) {
    %c0_i32 = arith.constant 0 : i32
    %c0_i32_0 = arith.constant 0 : i32
    %c0_i32_1 = arith.constant 0 : i32
    return %c0_i32, %c0_i32_0 : i32, i32
  }
  func.func @transform_5(%arg0: i32, %arg1: i32) -> (i32, i32) {
    %c0_i32 = arith.constant 0 : i32
    %c0_i32_0 = arith.constant 0 : i32
    return %arg0, %c0_i32 : i32, i32
  }
}

</mosaic_0001>

<bundles_post_ra>
// kernel: tpu_custom_call.1
= control target key start
LH: loop header
LB: loop body
LE: loop exit
PB: predicated region body
PF: predicated region fallthrough
CT: control target
= control target key end

     0   :  { %s3618_s0 = inlined_call_operand.hbm [shape: bf16[16,384], index: 0, kind: input, shape index: {}]   ;;  %s3619_s1 = inlined_call_operand.hbm [shape: bf16[384,1536], index: 1, kind: input, shape index: {}]   ;;  %s3620_s2 = inlined_call_operand.hbm [shape: f32[1,1536], index: 2, kind: input, shape index: {}]   ;;  %s3621_s3 = inlined_call_operand.hbm [shape: bf16[1536,384], index: 3, kind: input, shape index: {}]   ;;  %s3622_s4 = inlined_call_operand.hbm [shape: f32[1,384], index: 4, kind: input, shape index: {}]   ;;  %s3623_s5 = inlined_call_operand.hbm [shape: f32[16,384], index: 5, kind: output, shape index: {}]  }
   0x1   :  { %3638 = sst [smem:[#allocation20_spill]] %s3619_s1 }
   0x2   :  { %3639 = sst [smem:[#allocation21_spill]] %s3622_s4 }
   0x3   :  { %3640 = sst [smem:[#allocation22_spill]] %s3623_s5 }
   0x4   :  { %10 = vsyncpa [#allocation3], 0 }
   0x5   :  { %11 = vsyncpa [#allocation6], 0 }
   0x6   :  { %13 = vsyncpa [#allocation6 + $0x1], 0 }
   0x7   :  { %14 = vsyncpa [#allocation9], 0 }
   0x8   :  { %16 = vsyncpa [#allocation9 + $0x1], 0 }
   0x9   :  { %17 = vsyncpa [#allocation4], 0  ;;  %s3109_s18 = smov 0   ;;  %s3111_s19 = smov 0  }
   0xa   :  { %s3113_s20 = smov 0   ;;  %s3115_s21 = smov 0  }
   0xb   :  { %s3117_s22 = smov 0   ;;  %s3119_s23 = smov 0  }
   0xc LB: > { %3641 = sst [smem:[#allocation17_spill]] %s3055_s21  ;;  %s3138_s24 = sadd.s32 4294967295, %s3063_s23   ;;  %s3063_s23 = sphi %s3119_s23, %s23_s23   ;;  %s3059_s22 = sphi %s3117_s22, %s3673_s22   ;;  %s3055_s21 = sphi %s3115_s21, %s3672_s21   ;;  %s3051_s20 = sphi %s3113_s20, %s3671_s20   ;;  %s3047_s19 = sphi %s3111_s19, %s3670_s19   ;;  %s3043_s18 = sphi %s3109_s18, %s3669_s18  }
   0xd   : > { %s68_s25 = sadd.s32 1, %s3051_s20  ;;  %p75_p0 = scmp.ne.s32.totalorder %s3051_s20, %s3047_s19 }
   0xe   : > { %p76_p1 = scmp.eq.s32.totalorder %s3063_s23, 0  ;;  %p81_p2 = scmp.ne.s32.totalorder %s3047_s19, %s3043_s18 }
   0xf   : > { %p3624_p3 = scmp.eq.s32.totalorder %s3138_s24, 0  ;;  %p2162_p5 = scmp.ge.s32.totalorder %s3063_s23, 1 }
  0x10   : > { %p77_p4 = por %p76_p1, %p75_p0  ;;  %p191_p7 = scmp.lt.s32.totalorder %s3063_s23, 4 }
  0x11   : > { %p3149_p6 = por %p3624_p3, %p81_p2  ;;  %s3065_s28 = smov [#allocation10]  }
  0x12   : > { %p3154_p8 = pnand %p2162_p5, %p191_p7  ;;  %s221_s29 = sshll.u32 %s3065_s28, 4  ;;  %s222_s29 = int_to_ptr.vmem [resolvable:$true] %s221_s29 }
  0x13   : > { %s3642_s26 = scalar_select %p3149_p6, 1, 0 }
  0x14   : > { %s3643_s27 = scalar_select %p3154_p8, 1, 0 }
  0x15   : > { %p2466_p9 = pneg %p3154_p8  ;;  %p2485_p10 = scmp.lt.s32.totalorder %s3063_s23, 3 }
  0x16   : > { %s3628_s30 = sand.u32 1, %s3063_s23   ;;  %s3646_s4 = sld [smem:[#allocation21_spill]] }
  0x17   : > { %p3164_p11 = pnand %p2466_p9, %p3624_p3  ;;  %p3168_p12 = pnand %p2485_p10, %p77_p4 }
  0x19   : > { %s3644_s6 = scalar_select %p3164_p11, 1, 0 }
  0x1a   : > { %s3645_s7 = scalar_select %p3168_p12, 1, 0 }
  0x1b   : > { %p3629_p0 = pneg %p3164_p11 }
  0x1c   : > { %s2825_s10 = scalar_lea.hbm %s3646_s4, 48 }
  0x1d   : > { %p2826_p13 = scmp.ne.s32.totalorder %s3646_s4, %s2825_s10  ;;  %p2832_p4 = scmp.lt.u32.totalorder %s2825_s10, %s3646_s4 }
  0x1f   : > { %p2828_p1 = pnand %p3629_p0, %p2826_p13 }
  0x21   : > { %p2829_p2 = pneg %p2828_p1 }
  0x23   : > { %p2834_p5 = pnand %p2832_p4, %p2829_p2 }
  0x25   : > { %2837 = shalt.err (!%p2834_p5)
}
  0x26   : > { %s2838_s15 = scalar_lea.vmem %s222_s29, 48  ;;  %s2845_s16 = scalar_lea.vmem %s222_s29, 64 }
  0x27   : > { %p2839_p7 = scmp.ne.s32.totalorder %s222_s29, %s2838_s15  ;;  %p2846_p3 = scmp.lt.s32.totalorder %s222_s29, %s222_s29 }
  0x28   : > { %p2847_p6 = scmp.lt.s32.totalorder %s2845_s16, %s2838_s15 }
  0x29   : > { %p2841_p9 = pnand %p2839_p7, %p3629_p0 }
  0x2a   : > { %p2848_p8 = por %p2847_p6, %p2846_p3 }
  0x2b   : > { %p2842_p10 = pneg %p2841_p9 }
  0x2d   : > { %p2849_p12 = pnand %p2848_p8, %p2842_p10 }
  0x2f   : > { %2852 = shalt.err (!%p2849_p12)
}
  0x30   : > { %2472 = dma.hbm_to_vmem [thread:$0]  (!%p3164_p11), %s3646_s4, 48, %s222_s29, [#allocation9]  }
  0x31   : > { %s32_s28 = sadd.s32 1, %s3059_s22  ;;  %s3632_s8 = sand.u32 1, %s3051_s20  }
  0x32   : > { %p33_p3 = scmp.ge.s32.totalorder %s32_s28, 3  ;;  %s3198_s9 = smul.u32 768, %s3632_s8 }
  0x33   : > { %s2378_s10 = sshll.u32 %s3059_s22, 8  ;;  %s3648_s1 = sld [smem:[#allocation20_spill]] }
  0x34   : > { %s3675_s28 = smov (%p33_p3, %s32_s28), 0  ;;  %s236_s14 = scalar_lea.vmem [#allocation5], %s3198_s9 }
  0x35   : > { %3647 = sst [smem:[#allocation18_spill]] %s3675_s28  ;;  %s65_s29 = ssub.s32 %s3059_s22, %s3675_s28 }
  0x36   : > { %s243_s15 = sshll.u32 %s236_s14, 4  ;;  %p66_p6 = scmp.eq.s32.totalorder %s65_s29, 0  ;;  %s3211_s15 = int_to_ptr.vmem [resolvable:$true] %s243_s15 }
  0x37   : > { %s3220_s17 = scalar_lea.sflag [#allocation6], %s3628_s30  ;;  %p3650_p12 = scmp.ne.s32.totalorder %s3645_s7, 0 }
  0x38   : > { %s3216_s16 = scalar_select %p66_p6, %s3051_s20, %s68_s25  }
  0x39   : > { %s3206_s13 = scalar_lea.hbm %s3648_s1, %s2378_s10  ;;  %p3226_p13 = pneg %p3650_p12 }
  0x3a   : > { %3649 = sst [smem:[#allocation19_spill]] %s3216_s16  ;;  %s2853_s18 = scalar_lea.hbm %s3206_s13, 12288 }
  0x3b   : > { %p2854_p8 = scmp.ne.s32.totalorder %s3206_s13, %s2853_s18  ;;  %s2858_s29 = scalar_lea.hbm %s3648_s1, 36864 }
  0x3c   : > { %s3651_s10 = scalar_select %p3226_p13, 1, 0 }
  0x3d   : > { %p2856_p1 = pnand %p3226_p13, %p2854_p8  ;;  %p2859_p4 = scmp.lt.u32.totalorder %s3206_s13, %s3648_s1 }
  0x3e   : > { %p2860_p5 = scmp.lt.u32.totalorder %s2858_s29, %s2853_s18  ;;  %p2862_p9 = scmp.lt.u32.totalorder %s2853_s18, %s3206_s13 }
  0x3f   : > { %p2857_p2 = pneg %p2856_p1 }
  0x40   : > { %p2861_p7 = por %p2860_p5, %p2859_p4 }
  0x42   : > { %p2863_p10 = por %p2862_p9, %p2861_p7 }
  0x44   : > { %p2864_p3 = pnand %p2863_p10, %p2857_p2 }
  0x46   : > { %2867 = shalt.err (!%p2864_p3)
}
  0x47   : > { %s2868_s30 = scalar_lea.vmem %s3211_s15, 12288  ;;  %s3066_s11 = smov [#allocation5]  }
  0x48   : > { %p2869_p6 = scmp.ne.s32.totalorder %s3211_s15, %s2868_s30  ;;  %s2873_s12 = sshll.u32 %s3066_s11, 4  ;;  %s2874_s12 = int_to_ptr.vmem [resolvable:$false] %s2873_s12 }
  0x49   : > { %s2875_s25 = scalar_lea.vmem %s2874_s12, 24576  ;;  %p2876_p0 = scmp.lt.s32.totalorder %s3211_s15, %s2874_s12 }
  0x4a   : > { %p2871_p8 = pnand %p2869_p6, %p3226_p13  ;;  %p2877_p11 = scmp.lt.s32.totalorder %s2875_s25, %s2868_s30 }
  0x4c   : > { %p2872_p1 = pneg %p2871_p8  ;;  %p2878_p4 = por %p2877_p11, %p2876_p0 }
  0x4e   : > { %p2879_p5 = pnand %p2878_p4, %p2872_p1 }
  0x50   : > { %2882 = shalt.err (!%p2879_p5)
}
  0x51   : > { %s3067_s18 = smov 768   ;;  %s3068_s29 = smov 256  }
  0x52   : > { %s3069_s14 = smov 16   ;;  %s3070_s8 = smov [#allocation2]  }
  0x53   : > { %2476 = dma.hbm_to_vmem [thread:$0]  (!%p3650_p12), %s3206_s13, 12288, %s3211_s15, %s3220_s17, %s3067_s18, %s3068_s29, %s3069_s14  }
  0x54   : > { %s207_s11 = sshll.u32 %s3070_s8, 4  ;;  %s3652_s1 = sand.u32 1, %s3051_s20   ;;  %s208_s11 = int_to_ptr.vmem [resolvable:$true] %s207_s11 }
  0x55   : > { %s2168_s12 = sshll.u32 %s3652_s1, 2  ;;  %s2883_s4 = scalar_lea.hbm %s3618_s0, 384 }
  0x56   : > { %p2884_p11 = scmp.ne.s32.totalorder %s3618_s0, %s2883_s4  ;;  %p3653_p0 = scmp.ne.s32.totalorder %s3644_s6, 0 }
  0x57   : > { %p2890_p10 = scmp.lt.u32.totalorder %s2883_s4, %s3618_s0 }
  0x58   : > { %p3654_p2 = pneg %p3653_p0 }
  0x5a   : > { %p2886_p7 = pnand %p2884_p11, %p3654_p2 }
  0x5c   : > { %p2887_p9 = pneg %p2886_p7 }
  0x5e   : > { %p2892_p3 = pnand %p2890_p10, %p2887_p9 }
  0x60   : > { %2895 = shalt.err (!%p2892_p3)
}
  0x61   : > { %s2896_s8 = scalar_lea.vmem %s208_s11, 384  ;;  %p3655_p8 = pmov %p3654_p2 }
  0x62   : > { %p2897_p6 = scmp.ne.s32.totalorder %s208_s11, %s2896_s8  ;;  %p2904_p5 = scmp.lt.s32.totalorder %s208_s11, %s208_s11 }
  0x63   : > { %p2905_p12 = scmp.lt.s32.totalorder %s2896_s8, %s2896_s8 }
  0x64   : > { %p2899_p1 = pnand %p2897_p6, %p3655_p8 }
  0x65   : > { %p2906_p13 = por %p2905_p12, %p2904_p5 }
  0x66   : > { %p2900_p4 = pneg %p2899_p1 }
  0x68   : > { %p2907_p2 = pnand %p2906_p13, %p2900_p4 }
  0x6a   : > { %2910 = shalt.err (!%p2907_p2)
}
  0x6b   : > { %s3071_s1 = smov 192   ;;  %s3072_s5 = smov 12  }
  0x6c   : > { %2469 = dma.hbm_to_vmem [thread:$0]  (!%p3653_p0), %s3618_s0, 384, %s208_s11, [#allocation3], %s3071_s1, %s3071_s1, %s3072_s5  }
  0x6d   : > { %s2379_s28 = sshll.u32 %s3059_s22, 6  ;;  %s257_s18 = scalar_lea.vmem [#allocation7], %s2168_s12 }
  0x6e   : > { %s3279_s16 = scalar_lea.hbm %s3620_s2, %s2379_s28  ;;  %s265_s29 = sshll.u32 %s257_s18, 4  ;;  %s266_s29 = int_to_ptr.vmem [resolvable:$true] %s265_s29 }
  0x6f   : > { %s2911_s6 = scalar_lea.hbm %s3279_s16, 64  ;;  %p3656_p13 = scmp.ne.s32.totalorder %s3651_s10, 0 }
  0x70   : > { %p2912_p12 = scmp.ne.s32.totalorder %s3279_s16, %s2911_s6  ;;  %s2916_s30 = scalar_lea.hbm %s3620_s2, 192 }
  0x71   : > { %p2917_p0 = scmp.lt.u32.totalorder %s3279_s16, %s3620_s2  ;;  %p2918_p9 = scmp.lt.u32.totalorder %s2916_s30, %s2911_s6 }
  0x72   : > { %p2914_p11 = pnand %p2912_p12, %p3656_p13  ;;  %p2920_p3 = scmp.lt.u32.totalorder %s2911_s6, %s3279_s16 }
  0x73   : > { %p2919_p10 = por %p2918_p9, %p2917_p0 }
  0x74   : > { %p2915_p7 = pneg %p2914_p11 }
  0x75   : > { %p2921_p6 = por %p2920_p3, %p2919_p10 }
  0x77   : > { %p2922_p8 = pnand %p2921_p6, %p2915_p7 }
  0x79   : > { %2925 = shalt.err (!%p2922_p8)
}
  0x7a   : > { %s2926_s12 = scalar_lea.vmem %s266_s29, 64  ;;  %s3073_s4 = smov [#allocation7]  }
  0x7b   : > { %p2927_p1 = scmp.ne.s32.totalorder %s266_s29, %s2926_s12  ;;  %s2931_s21 = sshll.u32 %s3073_s4, 4  ;;  %s2932_s21 = int_to_ptr.vmem [resolvable:$false] %s2931_s21 }
  0x7c   : > { %s2933_s28 = scalar_lea.vmem %s2932_s21, 128  ;;  %p2934_p2 = scmp.lt.s32.totalorder %s266_s29, %s2932_s21 }
  0x7d   : > { %p2929_p4 = pnand %p2927_p1, %p3656_p13  ;;  %p2935_p12 = scmp.lt.s32.totalorder %s2933_s28, %s2926_s12 }
  0x7f   : > { %p2930_p5 = pneg %p2929_p4  ;;  %p2936_p11 = por %p2935_p12, %p2934_p2 }
  0x81   : > { %p2937_p0 = pnand %p2936_p11, %p2930_p5 }
  0x83   : > { %2940 = shalt.err (!%p2937_p0)
}
  0x84   : > { %p3657_p9 = scmp.ne.s32.totalorder %s3645_s7, 0  ;;  %s2446_s13 = smul.u32 12288, %s3059_s22 }
  0x85   : > { %s276_s15 = scalar_lea.vmem [#allocation8], %s3198_s9  ;;  %s3658_s30 = sand.u32 1, %s3063_s23  }
  0x86   : > { %2479 = dma.hbm_to_vmem [thread:$0]  (!%p3657_p9), %s3279_s16, 64, %s266_s29, %s3220_s17  }
  0x87   : > { %s284_s18 = sshll.u32 %s276_s15, 4  ;;  %s3304_s11 = scalar_lea.hbm %s3621_s3, %s2446_s13  ;;  %s3306_s18 = int_to_ptr.vmem [resolvable:$true] %s284_s18 }
  0x88   : > { %s3310_s25 = scalar_lea.sflag [#allocation9], %s3658_s30  ;;  %s2941_s8 = scalar_lea.hbm %s3304_s11, 12288 }
  0x89   : > { %p2942_p7 = scmp.ne.s32.totalorder %s3304_s11, %s2941_s8  ;;  %s2946_s16 = scalar_lea.hbm %s3621_s3, 36864 }
  0x8a   : > { %p2947_p6 = scmp.lt.u32.totalorder %s3304_s11, %s3621_s3  ;;  %p2948_p8 = scmp.lt.u32.totalorder %s2946_s16, %s2941_s8 }
  0x8b   : > { %p2944_p10 = pnand %p2942_p7, %p3656_p13  ;;  %p2950_p4 = scmp.lt.u32.totalorder %s2941_s8, %s3304_s11 }
  0x8c   : > { %p2949_p1 = por %p2948_p8, %p2947_p6 }
  0x8d   : > { %p2945_p3 = pneg %p2944_p10 }
  0x8e   : > { %p2951_p5 = por %p2950_p4, %p2949_p1 }
  0x90   : > { %p2952_p2 = pnand %p2951_p5, %p2945_p3 }
  0x92   : > { %2955 = shalt.err (!%p2952_p2)
}
  0x93   : > { %s2956_s4 = scalar_lea.vmem %s3306_s18, 12288  ;;  %s3074_s21 = smov [#allocation8]  }
  0x94   : > { %p2957_p12 = scmp.ne.s32.totalorder %s3306_s18, %s2956_s4  ;;  %s2961_s28 = sshll.u32 %s3074_s21, 4  ;;  %s2962_s28 = int_to_ptr.vmem [resolvable:$false] %s2961_s28 }
  0x95   : > { %s2963_s13 = scalar_lea.vmem %s2962_s28, 24576  ;;  %p2964_p7 = scmp.lt.s32.totalorder %s3306_s18, %s2962_s28 }
  0x96   : > { %p2959_p11 = pnand %p2957_p12, %p3656_p13  ;;  %p2965_p10 = scmp.lt.s32.totalorder %s2963_s13, %s2956_s4 }
  0x98   : > { %p2960_p0 = pneg %p2959_p11  ;;  %p2966_p6 = por %p2965_p10, %p2964_p7 }
  0x9a   : > { %p2967_p8 = pnand %p2966_p6, %p2960_p0 }
  0x9c   : > { %2970 = shalt.err (!%p2967_p8)
}
  0x9d   : > { %2482 = dma.hbm_to_vmem [thread:$0]  (!%p3657_p9), %s3304_s11, 12288, %s3306_s18, %s3310_s25, %s3071_s1, %s3071_s1, %s3072_s5  }
  0x9e   : > { %p3659_p13 = scmp.ne.s32.totalorder %s3643_s27, 0 }
  0x9f   : > { %p3660_p3 = scmp.eq.s32.totalorder (!%p3659_p13), %s3138_s24, 0 }
  0xa0   : > { %296 = sbr.rel (%p3659_p13) target bundleno = 792 (0x318), region = 40 }
  0xa7   : > { %3022 = dma.done.wait (%p3660_p3), [#allocation3], 384   ;;  %p3661_p1 = pmov %p3660_p3 }
  0xa8   : > { %s302_s7 = sand.u32 1, %s3138_s24   ;;  %s304_s10 = sand.u32 1, %s3047_s19  }
  0xa9   : > { %3024 = vsyncadd (%p3661_p1), [#allocation3], 4294966912  ;;  %s2447_s15 = smul.u32 768, %s304_s10  ;;  %s303_s6 = scalar_lea.sflag [#allocation6], %s302_s7 }
  0xaa   : > { %p3662_p4 = scmp.ne.s32.totalorder %s3642_s26, 0 }
  0xab   : > { %s3345_s14 = scalar_lea.vmem [#allocation5], %s2447_s15 }
  0xac   : > { %3026 = dma.done.wait (%p3662_p4), %s303_s6, 12352  }
  0xad   : > { %3028 = vsyncadd (%p3662_p4), %s303_s6, 4294954944  ;;  %s3351_s27 = sshll.u32 %s304_s10, 2  ;;  %s321_s5 = scalar_lea.sflag [#allocation9], %s302_s7 }
  0xae   : > { %s315_s1 = scalar_lea.vmem [#allocation7], %s3351_s27  ;;  %s3354_s18 = scalar_lea.vmem [#allocation8], %s2447_s15 }
  0xaf   : > { %3030 = dma.done.wait (%p3662_p4), %s321_s5, 12288  }
  0xb0   : > { %3032 = vsyncadd (%p3662_p4), %s321_s5, 4294955008  ;;  %p3663_p9 = pmov %p3661_p1 }
  0xb1   : > { %p3664_p5 = pmov %p3661_p1 }
  0xb2   : > { %3034 = dma.done.wait (%p3663_p9), [#allocation9], 48  }
  0xb3   : > { %3036 = vsyncadd (%p3664_p5), [#allocation9], 4294967248  ;;  %s3665_s11 = sld [smem:[#allocation17_spill]] }
  0xb9   : > { %p2178_p2 = scmp.ne.s32.totalorder %s3665_s11, 0 }
  0xba   : > { %v372_v0 = vlaneseq (!%p2178_p2)  ;;  %v370_v2 = vld [vmem:[#allocation10] sm:$0x7] (!%p2178_p2) }
  0xbb   : > { %369 = sbr.rel (%p2178_p2) target bundleno = 197 (0xc5), region = 64 }
  0xbc   : > { %v373_v1 = vshrl.u32 (!%p2178_p2), %v372_v0, 7 }
  0xbe   : > { %v374_v3 = vsub.s32 (!%p2178_p2), 0, %v373_v1  ;;  %v378_v4 = vsub.s32 (!%p2178_p2), 1, %v373_v1  ;;  %v382_v5 = vsub.s32 (!%p2178_p2), 2, %v373_v1 }
  0xc0   : > { %v375_v6 = vrot.slane (!%p2178_p2), %v370_v2, %v374_v3  ;;  %v379_v7 = vrot.slane (!%p2178_p2), %v370_v2, %v378_v4  ;;  %v383_v8 = vrot.slane (!%p2178_p2), %v370_v2, %v382_v5 }
  0xc2   : > { %387 = vst [vmem:[#allocation11] sm:$0xff] %v375_v6  ;;  %390 = vst [vmem:[#allocation11 + $0x18] sm:$0xff] %v375_v6 }
  0xc3   : > { %388 = vst [vmem:[#allocation11 + $0x8] sm:$0xff] %v379_v7  ;;  %391 = vst [vmem:[#allocation11 + $0x20] sm:$0xff] %v379_v7 }
  0xc4   : > { %389 = vst [vmem:[#allocation11 + $0x10] sm:$0xff] %v383_v8  ;;  %392 = vst [vmem:[#allocation11 + $0x28] sm:$0xff] %v383_v8 }
  0xc5 PF: > { %v2549_v9 = vld [vmem:[%s3345_s14 + $0x4] ss:$16 sps:$4 sm:$0xff]   ;;  %v3075_v11 = vmov 0   ;;  %v2553_v12 = vld [vmem:[%s3345_s14] ss:$16 sps:$4 sm:$0xff]   ;;  %s3076_s26 = smov [#allocation11]  }
  0xc6   : > { %v2551_v10 = vld [vmem:[%s3345_s14 + $0x204] ss:$16 sps:$4 sm:$0xff]   ;;  %1086 = vmatprep.mubr.bf16.mxu1 %v3075_v11  ;;  %1011 = vmatprep.subr.bf16.mxu0 %v2549_v9  ;;  %v2554_v13 = vld [vmem:[%s3345_s14 + $0x200] ss:$16 sps:$4 sm:$0xff]   ;;  %v2602_v43 = vld [vmem:[%s3345_s14 + $0xc] ss:$16 sps:$4 sm:$0xff]  }
  0xc7   : > { %1054 = vmatprep.subr.bf16.mxu1 %v2551_v10  ;;  %v2555_v14 = vld [vmem:[%s3345_s14 + $0x24] ss:$16 sps:$4 sm:$0xff]   ;;  %1012 = vmatpush1.bf16.msra.mxu0 %v2553_v12  ;;  %v2559_v16 = vld [vmem:[%s3345_s14 + $0x20] ss:$16 sps:$4 sm:$0xff]   ;;  %v2600_v45 = vld [vmem:[%s3345_s14 + $0x8] ss:$16 sps:$4 sm:$0xff]  }
  0xc8   : > { %1055 = vmatpush1.bf16.msra.mxu1 %v2554_v13  ;;  %v2557_v15 = vld [vmem:[%s3345_s14 + $0x224] ss:$16 sps:$4 sm:$0xff]   ;;  %1013 = vmatprep.subr.bf16.mxu0 %v2555_v14  ;;  %v2560_v17 = vld [vmem:[%s3345_s14 + $0x220] ss:$16 sps:$4 sm:$0xff]   ;;  %v2608_v48 = vld [vmem:[%s3345_s14 + $0x2c] ss:$16 sps:$4 sm:$0xff]  }
  0xc9   : > { %1056 = vmatprep.subr.bf16.mxu1 %v2557_v15  ;;  %v2561_v18 = vld [vmem:[%s3345_s14 + $0x44] ss:$16 sps:$4 sm:$0xff]   ;;  %v2565_v20 = vld [vmem:[%s3345_s14 + $0x40] ss:$16 sps:$4 sm:$0xff]   ;;  %v2606_v49 = vld [vmem:[%s3345_s14 + $0x28] ss:$16 sps:$4 sm:$0xff]  }
  0xca   : > { %v2563_v19 = vld [vmem:[%s3345_s14 + $0x244] ss:$16 sps:$4 sm:$0xff]   ;;  %v2566_v21 = vld [vmem:[%s3345_s14 + $0x240] ss:$16 sps:$4 sm:$0xff]   ;;  %v2614_v52 = vld [vmem:[%s3345_s14 + $0x4c] ss:$16 sps:$4 sm:$0xff]  }
  0xcb   : > { %1014 = vmatpush1.bf16.msra.mxu0 %v2559_v16  ;;  %v2567_v22 = vld [vmem:[%s3345_s14 + $0x64] ss:$16 sps:$4 sm:$0xff]   ;;  %v2571_v24 = vld [vmem:[%s3345_s14 + $0x60] ss:$16 sps:$4 sm:$0xff]   ;;  %v2612_v53 = vld [vmem:[%s3345_s14 + $0x48] ss:$16 sps:$4 sm:$0xff]  }
  0xcc   : > { %1057 = vmatpush1.bf16.msra.mxu1 %v2560_v17  ;;  %1015 = vmatprep.subr.bf16.mxu0 %v2561_v18  ;;  %v2569_v23 = vld [vmem:[%s3345_s14 + $0x264] ss:$16 sps:$4 sm:$0xff]   ;;  %v2572_v25 = vld [vmem:[%s3345_s14 + $0x260] ss:$16 sps:$4 sm:$0xff]   ;;  %v2620_v56 = vld [vmem:[%s3345_s14 + $0x6c] ss:$16 sps:$4 sm:$0xff]  }
  0xcd   : > { %1058 = vmatprep.subr.bf16.mxu1 %v2563_v19  ;;  %v2573_v26 = vld [vmem:[%s3345_s14 + $0x84] ss:$16 sps:$4 sm:$0xff]   ;;  %v2577_v28 = vld [vmem:[%s3345_s14 + $0x80] ss:$16 sps:$4 sm:$0xff]   ;;  %v2618_v57 = vld [vmem:[%s3345_s14 + $0x68] ss:$16 sps:$4 sm:$0xff]  }
  0xce   : > { %v2575_v27 = vld [vmem:[%s3345_s14 + $0x284] ss:$16 sps:$4 sm:$0xff]   ;;  %v2578_v29 = vld [vmem:[%s3345_s14 + $0x280] ss:$16 sps:$4 sm:$0xff]   ;;  %v2648_v60 = vld [vmem:[#allocation2 + $0x4] ss:$12 sps:$4 sm:$0xff]  }
  0xcf   : > { %1016 = vmatpush1.bf16.msra.mxu0 %v2565_v20  ;;  %v2579_v30 = vld [vmem:[%s3345_s14 + $0xa4] ss:$16 sps:$4 sm:$0xff]   ;;  %v2583_v32 = vld [vmem:[%s3345_s14 + $0xa0] ss:$16 sps:$4 sm:$0xff]   ;;  %v2626_v61 = vld [vmem:[%s3345_s14 + $0x8c] ss:$16 sps:$4 sm:$0xff]   ;;  %1043 = vmatprep.mubr.bf16.mxu0 %v2648_v60 }
  0xd0   : > { %1059 = vmatpush1.bf16.msra.mxu1 %v2566_v21  ;;  %1017 = vmatprep.subr.bf16.mxu0 %v2567_v22  ;;  %v2581_v31 = vld [vmem:[%s3345_s14 + $0x2a4] ss:$16 sps:$4 sm:$0xff]   ;;  %v2584_v33 = vld [vmem:[%s3345_s14 + $0x2a0] ss:$16 sps:$4 sm:$0xff]   ;;  %v2624_v62 = vld [vmem:[%s3345_s14 + $0x88] ss:$16 sps:$4 sm:$0xff]  }
  0xd1   : > { %1060 = vmatprep.subr.bf16.mxu1 %v2569_v23  ;;  %v2585_v34 = vld [vmem:[%s3345_s14 + $0xc4] ss:$16 sps:$4 sm:$0xff]   ;;  %v2589_v36 = vld [vmem:[%s3345_s14 + $0xc0] ss:$16 sps:$4 sm:$0xff]   ;;  %v2632_v1 = vld [vmem:[%s3345_s14 + $0xac] ss:$16 sps:$4 sm:$0xff]  }
  0xd2   : > { %v2587_v35 = vld [vmem:[%s3345_s14 + $0x2c4] ss:$16 sps:$4 sm:$0xff]   ;;  %v2590_v37 = vld [vmem:[%s3345_s14 + $0x2c0] ss:$16 sps:$4 sm:$0xff]   ;;  %v2630_v2 = vld [vmem:[%s3345_s14 + $0xa8] ss:$16 sps:$4 sm:$0xff]  }
  0xd3   : > { %1018 = vmatpush1.bf16.msra.mxu0 %v2571_v24  ;;  %v2591_v38 = vld [vmem:[%s3345_s14 + $0xe4] ss:$16 sps:$4 sm:$0xff]   ;;  %v2595_v40 = vld [vmem:[%s3345_s14 + $0xe0] ss:$16 sps:$4 sm:$0xff]   ;;  %v2638_v5 = vld [vmem:[%s3345_s14 + $0xcc] ss:$16 sps:$4 sm:$0xff]  }
  0xd4   : > { %1061 = vmatpush1.bf16.msra.mxu1 %v2572_v25  ;;  %1019 = vmatprep.subr.bf16.mxu0 %v2573_v26  ;;  %v2593_v39 = vld [vmem:[%s3345_s14 + $0x2e4] ss:$16 sps:$4 sm:$0xff]   ;;  %v2596_v41 = vld [vmem:[%s3345_s14 + $0x2e0] ss:$16 sps:$4 sm:$0xff]   ;;  %v2636_v6 = vld [vmem:[%s3345_s14 + $0xc8] ss:$16 sps:$4 sm:$0xff]  }
  0xd5   : > { %1062 = vmatprep.subr.bf16.mxu1 %v2575_v27  ;;  %v2597_v42 = vld [vmem:[%s3345_s14 + $0x104] ss:$16 sps:$4 sm:$0xff]   ;;  %v3400_v44 = vld [vmem:[#allocation2 + $0x8] ss:$12 sps:$4 sm:$0xff]   ;;  %v2642_v10 = vld [vmem:[%s3345_s14 + $0xe8] ss:$16 sps:$4 sm:$0xff]  }
  0xd6   : > { %v2603_v46 = vld [vmem:[%s3345_s14 + $0x100] ss:$16 sps:$4 sm:$0xff]   ;;  %v2604_v47 = vld [vmem:[%s3345_s14 + $0x124] ss:$16 sps:$4 sm:$0xff]   ;;  %v2644_v9 = vld [vmem:[%s3345_s14 + $0xec] ss:$16 sps:$4 sm:$0xff]  }
  0xd7   : > { %1020 = vmatpush1.bf16.msra.mxu0 %v2577_v28  ;;  %v2609_v50 = vld [vmem:[%s3345_s14 + $0x120] ss:$16 sps:$4 sm:$0xff]   ;;  %v2610_v51 = vld [vmem:[%s3345_s14 + $0x144] ss:$16 sps:$4 sm:$0xff]   ;;  %v2651_v13 = vld [vmem:[%s3345_s14 + $0x10c] ss:$16 sps:$4 sm:$0xff]  }
  0xd8   : > { %1063 = vmatpush1.bf16.msra.mxu1 %v2578_v29  ;;  %1021 = vmatprep.subr.bf16.mxu0 %v2579_v30  ;;  %v2615_v54 = vld [vmem:[%s3345_s14 + $0x140] ss:$16 sps:$4 sm:$0xff]   ;;  %v2616_v55 = vld [vmem:[%s3345_s14 + $0x164] ss:$16 sps:$4 sm:$0xff]   ;;  %v2649_v15 = vld [vmem:[%s3345_s14 + $0x108] ss:$16 sps:$4 sm:$0xff]  }
  0xd9   : > { %1064 = vmatprep.subr.bf16.mxu1 %v2581_v31  ;;  %v2621_v58 = vld [vmem:[%s3345_s14 + $0x160] ss:$16 sps:$4 sm:$0xff]   ;;  %v2622_v59 = vld [vmem:[%s3345_s14 + $0x184] ss:$16 sps:$4 sm:$0xff]   ;;  %v2654_v16 = vld [vmem:[%s3345_s14 + $0x12c] ss:$16 sps:$4 sm:$0xff]  }
  0xda   : > { %v2627_v63 = vld [vmem:[%s3345_s14 + $0x180] ss:$16 sps:$4 sm:$0xff]   ;;  %v2628_v0 = vld [vmem:[%s3345_s14 + $0x1a4] ss:$16 sps:$4 sm:$0xff]   ;;  %v2699_v18 = vld [vmem:[%s3354_s18 + $0x4] ss:$12 sps:$4 sm:$0xff]  }
  0xdb   : > { %1022 = vmatpush1.bf16.msra.mxu0 %v2583_v32  ;;  %v2633_v3 = vld [vmem:[%s3345_s14 + $0x1a0] ss:$16 sps:$4 sm:$0xff]   ;;  %v2634_v4 = vld [vmem:[%s3345_s14 + $0x1c4] ss:$16 sps:$4 sm:$0xff]   ;;  %v2652_v19 = vld [vmem:[%s3345_s14 + $0x128] ss:$16 sps:$4 sm:$0xff]  }
  0xdc   : > { %1065 = vmatpush1.bf16.msra.mxu1 %v2584_v33  ;;  %1023 = vmatprep.subr.bf16.mxu0 %v2585_v34  ;;  %v2639_v7 = vld [vmem:[%s3345_s14 + $0x1c0] ss:$16 sps:$4 sm:$0xff]   ;;  %v2640_v8 = vld [vmem:[%s3345_s14 + $0x1e4] ss:$16 sps:$4 sm:$0xff]   ;;  %v2657_v21 = vld [vmem:[%s3345_s14 + $0x14c] ss:$16 sps:$4 sm:$0xff]  }
  0xdd   : > { %1066 = vmatprep.subr.bf16.mxu1 %v2587_v35  ;;  %v2645_v12 = vld [vmem:[%s3345_s14 + $0x1e0] ss:$16 sps:$4 sm:$0xff]   ;;  %v2646_v14 = vld [vmem:[#allocation2] ss:$12 sps:$4 sm:$0xff]   ;;  %v2660_v25 = vld [vmem:[%s3345_s14 + $0x16c] ss:$16 sps:$4 sm:$0xff]  }
  0xde   : > { %v2697_v17 = vld [vmem:[%s3354_s18] ss:$12 sps:$4 sm:$0xff]   ;;  %v2702_v20 = vld [vmem:[%s3354_s18 + $0x1c] ss:$12 sps:$4 sm:$0xff]   ;;  %v2700_v22 = vld [vmem:[%s3354_s18 + $0x18] ss:$12 sps:$4 sm:$0xff]  }
  0xdf   : > { %1024 = vmatpush1.bf16.msra.mxu0 %v2589_v36  ;;  %v2655_v23 = vld [vmem:[%s3345_s14 + $0x148] ss:$16 sps:$4 sm:$0xff]   ;;  %v2708_v27 = vld [vmem:[%s3354_s18 + $0x4c] ss:$12 sps:$4 sm:$0xff]   ;;  %v2663_v29 = vld [vmem:[%s3345_s14 + $0x18c] ss:$16 sps:$4 sm:$0xff]  }
  0xe0   : > { %1067 = vmatpush1.bf16.msra.mxu1 %v2590_v37  ;;  %1025 = vmatprep.subr.bf16.mxu0 %v2591_v38  ;;  %v2705_v24 = vld [vmem:[%s3354_s18 + $0x34] ss:$12 sps:$4 sm:$0xff]   ;;  %v2703_v26 = vld [vmem:[%s3354_s18 + $0x30] ss:$12 sps:$4 sm:$0xff]   ;;  %s2031_s30 = sshll.u32 %s3076_s26, 4  ;;  %p2488_p12 = scmp.eq.s32.totalorder %s3138_s24, 2  ;;  %s2032_s30 = int_to_ptr.vmem [resolvable:$true] %s2031_s30 }
  0xe1   : > { %1068 = vmatprep.subr.bf16.mxu1 %v2593_v39  ;;  %v2658_v28 = vld [vmem:[%s3345_s14 + $0x168] ss:$16 sps:$4 sm:$0xff]   ;;  %v2706_v30 = vld [vmem:[%s3354_s18 + $0x48] ss:$12 sps:$4 sm:$0xff]   ;;  %s2971_s25 = scalar_lea.vmem %s2032_s30, 768  ;;  %p2978_p10 = scmp.lt.s32.totalorder %s2032_s30, %s2032_s30 }
  0xe2   : > { %v2711_v31 = vld [vmem:[%s3354_s18 + $0x64] ss:$12 sps:$4 sm:$0xff]   ;;  %v2709_v34 = vld [vmem:[%s3354_s18 + $0x60] ss:$12 sps:$4 sm:$0xff]   ;;  %p2972_p11 = scmp.ne.s32.totalorder %s2032_s30, %s2971_s25  ;;  %p2979_p6 = scmp.lt.s32.totalorder %s2971_s25, %s2971_s25 }
  0xe3   : > { %1026 = vmatpush1.bf16.msra.mxu0 %v2595_v40  ;;  %v2661_v32 = vld [vmem:[%s3345_s14 + $0x188] ss:$16 sps:$4 sm:$0xff]   ;;  %v2666_v33 = vld [vmem:[%s3345_s14 + $0x1ac] ss:$16 sps:$4 sm:$0xff]  }
  0xe4   : > { %1069 = vmatpush1.bf16.msra.mxu1 %v2596_v41  ;;  %1027 = vmatprep.subr.bf16.mxu0 %v2597_v42  ;;  %v2664_v35 = vld [vmem:[%s3345_s14 + $0x1a8] ss:$16 sps:$4 sm:$0xff]   ;;  %v2669_v36 = vld [vmem:[%s3345_s14 + $0x1cc] ss:$16 sps:$4 sm:$0xff]   ;;  %p2973_p0 = pnand %p2972_p11, %p2488_p12  ;;  %p2980_p8 = por %p2979_p6, %p2978_p10 }
  0xe5   : > { %1097 = vmatprep.subr.bf16.mxu1 %v2602_v43  ;;  %v2667_v37 = vld [vmem:[%s3345_s14 + $0x1c8] ss:$16 sps:$4 sm:$0xff]   ;;  %v2672_v38 = vld [vmem:[%s3345_s14 + $0x1ec] ss:$16 sps:$4 sm:$0xff]  }
  0xe6   : > { %v2670_v39 = vld [vmem:[%s3345_s14 + $0x1e8] ss:$16 sps:$4 sm:$0xff]   ;;  %v2675_v40 = vld [vmem:[%s3345_s14 + $0x20c] ss:$16 sps:$4 sm:$0xff]   ;;  %p2974_p7 = pneg %p2973_p0 }
  0xe7   : > { %1087 = vmatmul.mubr.bf16.vlgmr.msra.gmra.mrb[0].mxu1 %v3400_v44  ;;  %1028 = vmatpush1.bf16.msra.mxu0 %v2603_v46  ;;  %v2673_v41 = vld [vmem:[%s3345_s14 + $0x208] ss:$16 sps:$4 sm:$0xff]   ;;  %v2678_v42 = vld [vmem:[%s3345_s14 + $0x22c] ss:$16 sps:$4 sm:$0xff]  }
  0xe8   : > { %1098 = vmatpush1.bf16.msra.mxu1 %v2600_v45  ;;  %1029 = vmatprep.subr.bf16.mxu0 %v2604_v47  ;;  %v2676_v43 = vld [vmem:[%s3345_s14 + $0x228] ss:$16 sps:$4 sm:$0xff]   ;;  %v2681_v45 = vld [vmem:[%s3345_s14 + $0x24c] ss:$16 sps:$4 sm:$0xff]   ;;  %p2981_p13 = pnand %p2980_p8, %p2974_p7 }
  0xe9   : > { %1099 = vmatprep.subr.bf16.mxu1 %v2608_v48  ;;  %1129 = vmatprep.mubr.bf16.mxu1 %v2648_v60  ;;  %v2679_v46 = vld [vmem:[%s3345_s14 + $0x248] ss:$16 sps:$4 sm:$0xff]   ;;  %v2684_v47 = vld [vmem:[%s3345_s14 + $0x26c] ss:$16 sps:$4 sm:$0xff]  }
  0xea   : > { %v2682_v48 = vld [vmem:[%s3345_s14 + $0x268] ss:$16 sps:$4 sm:$0xff]   ;;  %v2718_v60 = vld [vmem:[%s3354_s18 + $0xa8] ss:$12 sps:$4 sm:$0xff]  }
  0xeb   : > { %1030 = vmatpush1.bf16.msra.mxu0 %v2609_v50  ;;  %v2685_v50 = vld [vmem:[%s3345_s14 + $0x288] ss:$16 sps:$4 sm:$0xff]  }
  0xec   : > { %1100 = vmatpush1.bf16.msra.mxu1 %v2606_v49  ;;  %1031 = vmatprep.subr.bf16.mxu0 %v2610_v51  ;;  %v2687_v49 = vld [vmem:[%s3345_s14 + $0x28c] ss:$16 sps:$4 sm:$0xff]   ;;  %v2688_v51 = vld [vmem:[%s3345_s14 + $0x2a8] ss:$16 sps:$4 sm:$0xff]  }
  0xed   : > { %1101 = vmatprep.subr.bf16.mxu1 %v2614_v52  ;;  %v2714_v52 = vld [vmem:[%s3354_s18 + $0x7c] ss:$12 sps:$4 sm:$0xff]  }
  0xef   : > { %1032 = vmatpush1.bf16.msra.mxu0 %v2615_v54  ;;  %v2712_v54 = vld [vmem:[%s3354_s18 + $0x78] ss:$12 sps:$4 sm:$0xff]  }
  0xf0   : > { %1102 = vmatpush1.bf16.msra.mxu1 %v2612_v53  ;;  %1033 = vmatprep.subr.bf16.mxu0 %v2616_v55  ;;  %v2693_v53 = vld [vmem:[%s3345_s14 + $0x2cc] ss:$16 sps:$4 sm:$0xff]   ;;  %v2691_v55 = vld [vmem:[%s3345_s14 + $0x2c8] ss:$16 sps:$4 sm:$0xff]  }
  0xf1   : > { %1103 = vmatprep.subr.bf16.mxu1 %v2620_v56  ;;  %v2717_v56 = vld [vmem:[%s3354_s18 + $0x94] ss:$12 sps:$4 sm:$0xff]  }
  0xf3   : > { %1034 = vmatpush1.bf16.msra.mxu0 %v2621_v58  ;;  %v2715_v58 = vld [vmem:[%s3354_s18 + $0x90] ss:$12 sps:$4 sm:$0xff]  }
  0xf4   : > { %1104 = vmatpush1.bf16.msra.mxu1 %v2618_v57  ;;  %1035 = vmatprep.subr.bf16.mxu0 %v2622_v59  ;;  %v2696_v57 = vld [vmem:[%s3345_s14 + $0x2ec] ss:$16 sps:$4 sm:$0xff]   ;;  %v2720_v59 = vld [vmem:[%s3354_s18 + $0xac] ss:$12 sps:$4 sm:$0xff]  }
  0xf5   : > { %1105 = vmatprep.subr.bf16.mxu1 %v2626_v61  ;;  %v2694_v61 = vld [vmem:[%s3345_s14 + $0x2e8] ss:$16 sps:$4 sm:$0xff]  }
  0xf7   : > { %1036 = vmatpush1.bf16.msra.mxu0 %v2627_v63  ;;  %v2724_v63 = vld [vmem:[%s3354_s18 + $0xc8] ss:$12 sps:$4 sm:$0xff]  }
  0xf8   : > { %1106 = vmatpush1.bf16.msra.mxu1 %v2624_v62  ;;  %1037 = vmatprep.subr.bf16.mxu0 %v2628_v0  ;;  %v2723_v62 = vld [vmem:[%s3354_s18 + $0xc4] ss:$12 sps:$4 sm:$0xff]   ;;  %v2721_v0 = vld [vmem:[%s3354_s18 + $0xc0] ss:$12 sps:$4 sm:$0xff]  }
  0xf9   : > { %1107 = vmatprep.subr.bf16.mxu1 %v2632_v1  ;;  %v2725_v1 = vld [vmem:[%s3354_s18 + $0x8] ss:$12 sps:$4 sm:$0xff]  }
  0xfb   : > { %1038 = vmatpush1.bf16.msra.mxu0 %v2633_v3  ;;  %v2729_v3 = vld [vmem:[%s3354_s18 + $0xe0] ss:$12 sps:$4 sm:$0xff]  }
  0xfc   : > { %1108 = vmatpush1.bf16.msra.mxu1 %v2630_v2  ;;  %1039 = vmatprep.subr.bf16.mxu0 %v2634_v4  ;;  %v2728_v2 = vld [vmem:[%s3354_s18 + $0xdc] ss:$12 sps:$4 sm:$0xff]   ;;  %v2726_v4 = vld [vmem:[%s3354_s18 + $0xd8] ss:$12 sps:$4 sm:$0xff]  }
  0xfd   : > { %1109 = vmatprep.subr.bf16.mxu1 %v2638_v5  ;;  %v2730_v5 = vld [vmem:[%s3354_s18 + $0x20] ss:$12 sps:$4 sm:$0xff]  }
  0xff   : > { %1040 = vmatpush1.bf16.msra.mxu0 %v2639_v7  ;;  %v2734_v7 = vld [vmem:[%s3354_s18 + $0xf8] ss:$12 sps:$4 sm:$0xff]  }
 0x100   : > { %1110 = vmatpush1.bf16.msra.mxu1 %v2636_v6  ;;  %1041 = vmatprep.subr.bf16.mxu0 %v2640_v8  ;;  %v2733_v6 = vld [vmem:[%s3354_s18 + $0xf4] ss:$12 sps:$4 sm:$0xff]   ;;  %v2731_v8 = vld [vmem:[%s3354_s18 + $0xf0] ss:$12 sps:$4 sm:$0xff]  }
 0x101   : > { %1111 = vmatprep.subr.bf16.mxu1 %v2644_v9  ;;  %v2735_v9 = vld [vmem:[%s3354_s18 + $0x38] ss:$12 sps:$4 sm:$0xff]  }
 0x103   : > { %1042 = vmatpush1.bf16.msra.mxu0 %v2645_v12  ;;  %v2736_v12 = vld [vmem:[%s3354_s18 + $0x108] ss:$12 sps:$4 sm:$0xff]  }
 0x104   : > { %1112 = vmatpush1.bf16.msra.mxu1 %v2642_v10  ;;  %1841 = vmatprep.subr.bf16.mxu0 %v2699_v18  ;;  %v2739_v10 = vld [vmem:[%s3354_s18 + $0x110] ss:$12 sps:$4 sm:$0xff]  }
 0x105   : > { %1113 = vmatprep.subr.bf16.mxu1 %v2651_v13  ;;  %v2740_v13 = vld [vmem:[%s3354_s18 + $0x50] ss:$12 sps:$4 sm:$0xff]  }
 0x106   : > { %1044 = vmatmul.mubr.bf16.vlgmr.msra.gmra.mrb[0].mxu0 %v2646_v14  ;;  %v2748_v18 = vld [vmem:[%s3354_s18 + $0x13c] ss:$12 sps:$4 sm:$0xff]  }
 0x107   : > { %1842 = vmatpush1.bf16.msra.mxu0 %v2697_v17  ;;  %v2745_v17 = vld [vmem:[%s3354_s18 + $0x68] ss:$12 sps:$4 sm:$0xff]  }
 0x108   : > { %1114 = vmatpush1.bf16.msra.mxu1 %v2649_v15  ;;  %1843 = vmatprep.subr.bf16.mxu0 %v2702_v20  ;;  %v2744_v15 = vld [vmem:[%s3354_s18 + $0x128] ss:$12 sps:$4 sm:$0xff]   ;;  %v2749_v20 = vld [vmem:[%s3354_s18 + $0x140] ss:$12 sps:$4 sm:$0xff]  }
 0x109   : > { %1115 = vmatprep.subr.bf16.mxu1 %v2654_v16  ;;  %v2741_v16 = vld [vmem:[%s3354_s18 + $0x120] ss:$12 sps:$4 sm:$0xff]  }
 0x10b   : > { %1844 = vmatpush1.bf16.msra.mxu0 %v2700_v22  ;;  %v2753_v22 = vld [vmem:[%s3354_s18 + $0x154] ss:$12 sps:$4 sm:$0xff]  }
 0x10c   : > { %1116 = vmatpush1.bf16.msra.mxu1 %v2652_v19  ;;  %1845 = vmatprep.subr.bf16.mxu0 %v2705_v24  ;;  %v2746_v19 = vld [vmem:[%s3354_s18 + $0x138] ss:$12 sps:$4 sm:$0xff]  }
 0x10d   : > { %1117 = vmatprep.subr.bf16.mxu1 %v2657_v21  ;;  %v2750_v21 = vld [vmem:[%s3354_s18 + $0x80] ss:$12 sps:$4 sm:$0xff]   ;;  %v2754_v24 = vld [vmem:[%s3354_s18 + $0x158] ss:$12 sps:$4 sm:$0xff]  }
 0x10f   : > { %1846 = vmatpush1.bf16.msra.mxu0 %v2703_v26  ;;  %v2758_v26 = vld [vmem:[%s3354_s18 + $0x16c] ss:$12 sps:$4 sm:$0xff]  }
 0x110   : > { %1118 = vmatpush1.bf16.msra.mxu1 %v2655_v23  ;;  %1847 = vmatprep.subr.bf16.mxu0 %v2708_v27  ;;  %v2751_v23 = vld [vmem:[%s3354_s18 + $0x150] ss:$12 sps:$4 sm:$0xff]   ;;  %v2756_v27 = vld [vmem:[%s3354_s18 + $0x168] ss:$12 sps:$4 sm:$0xff]  }
 0x111   : > { %1119 = vmatprep.subr.bf16.mxu1 %v2660_v25  ;;  %v2755_v25 = vld [vmem:[%s3354_s18 + $0x98] ss:$12 sps:$4 sm:$0xff]  }
 0x113   : > { %1848 = vmatpush1.bf16.msra.mxu0 %v2706_v30  ;;  %v2763_v30 = vld [vmem:[%s3354_s18 + $0x184] ss:$12 sps:$4 sm:$0xff]  }
 0x114   : > { %1120 = vmatpush1.bf16.msra.mxu1 %v2658_v28  ;;  %1849 = vmatprep.subr.bf16.mxu0 %v2711_v31  ;;  %v2759_v28 = vld [vmem:[%s3354_s18 + $0x170] ss:$12 sps:$4 sm:$0xff]   ;;  %v2785_v31 = vld [vmem:[%s3354_s18 + $0x248] ss:$12 sps:$4 sm:$0xff]  }
 0x115   : > { %1121 = vmatprep.subr.bf16.mxu1 %v2663_v29  ;;  %v2760_v29 = vld [vmem:[%s3354_s18 + $0xb0] ss:$12 sps:$4 sm:$0xff]  }
 0x117   : > { %1850 = vmatpush1.bf16.msra.mxu0 %v2709_v34 }
 0x118   : > { %1122 = vmatpush1.bf16.msra.mxu1 %v2661_v32  ;;  %1851 = vmatprep.subr.bf16.mxu0 %v2714_v52 }
 0x119   : > { %1123 = vmatprep.subr.bf16.mxu1 %v2666_v33 }
 0x11b   : > { %1852 = vmatpush1.bf16.msra.mxu0 %v2712_v54 }
 0x11c   : > { %1124 = vmatpush1.bf16.msra.mxu1 %v2664_v35  ;;  %1853 = vmatprep.subr.bf16.mxu0 %v2717_v56 }
 0x11d   : > { %1125 = vmatprep.subr.bf16.mxu1 %v2669_v36  ;;  %v495_v36 = vlaneseq }
 0x11f   : > { %1854 = vmatpush1.bf16.msra.mxu0 %v2715_v58 }
 0x120   : > { %1126 = vmatpush1.bf16.msra.mxu1 %v2667_v37  ;;  %1855 = vmatprep.subr.bf16.mxu0 %v2720_v59  ;;  %v3517_v37 = vshrl.u32 %v495_v36, 7 }
 0x121   : > { %1127 = vmatprep.subr.bf16.mxu1 %v2672_v38 }
 0x122   : > { %v497_v38 = vsub.s32 0, %v3517_v37  ;;  %v505_v36 = vsub.s32 2, %v3517_v37 }
 0x123   : > { %1856 = vmatpush1.bf16.msra.mxu0 %v2718_v60 }
 0x124   : > { %1128 = vmatpush1.bf16.msra.mxu1 %v2670_v39  ;;  %1857 = vmatprep.subr.bf16.mxu0 %v2723_v62  ;;  %v3522_v39 = vld [vmem:[%s315_s1] sm:$0xf]  ;;  %v2789_v62 = vld [vmem:[%s3354_s18 + $0x188] ss:$12 sps:$4 sm:$0xff]  }
 0x125   : > { %1140 = vmatprep.subr.bf16.mxu1 %v2675_v40  ;;  %v501_v40 = vsub.s32 1, %v3517_v37 }
 0x127   : > { %1130 = vmatmul.mubr.bf16.vlgmr.msra.gmra.mrb[4].mxu1 %v2646_v14  ;;  %1858 = vmatpush1.bf16.msra.mxu0 %v2721_v0  ;;  %v2743_v14 = vld [vmem:[%s3354_s18 + $0x124] ss:$12 sps:$4 sm:$0xff]   ;;  %v2790_v0 = vld [vmem:[%s3354_s18 + $0x260] ss:$12 sps:$4 sm:$0xff]  }
 0x128   : > { %1141 = vmatpush1.bf16.msra.mxu1 %v2673_v41  ;;  %1172 = vmatprep.mubr.bf16.mxu1 %v3075_v11  ;;  %v2690_v11 = vld [vmem:[%s3345_s14 + $0x2ac] ss:$16 sps:$4 sm:$0xff]   ;;  %v498_v41 = vrot.slane %v3522_v39, %v497_v38  ;;  %v2806_v38 = vld [vmem:[%s3354_s18 + $0x2a0] ss:$12 sps:$4 sm:$0xff]  }
 0x129   : > { %1142 = vmatprep.subr.bf16.mxu1 %v2678_v42  ;;  %1859 = vmatprep.subr.bf16.mxu0 %v2728_v2  ;;  %v502_v42 = vrot.slane %v3522_v39, %v501_v40  ;;  %v2794_v2 = vld [vmem:[%s3354_s18 + $0x1a0] ss:$12 sps:$4 sm:$0xff]   ;;  %v509_v40 = vsub.s32 3, %v3517_v37 }
 0x12b   : > { %1860 = vmatpush1.bf16.msra.mxu0 %v2726_v4  ;;  %v2795_v4 = vld [vmem:[%s3354_s18 + $0x278] ss:$12 sps:$4 sm:$0xff]  }
 0x12c   : > { %1143 = vmatpush1.bf16.msra.mxu1 %v2676_v43  ;;  %1861 = vmatprep.subr.bf16.mxu0 %v2733_v6  ;;  %v2799_v6 = vld [vmem:[%s3354_s18 + $0x1b8] ss:$12 sps:$4 sm:$0xff]  }
 0x12d   : > { %1144 = vmatprep.subr.bf16.mxu1 %v2681_v45 }
 0x12f   : > { %1862 = vmatpush1.bf16.msra.mxu0 %v2731_v8  ;;  %v2800_v8 = vld [vmem:[%s3354_s18 + $0x290] ss:$12 sps:$4 sm:$0xff]  }
 0x130   : > { %1145 = vmatpush1.bf16.msra.mxu1 %v2679_v46 }
 0x131   : > { %1146 = vmatprep.subr.bf16.mxu1 %v2684_v47 }
 0x134   : > { %1147 = vmatpush1.bf16.msra.mxu1 %v2682_v48 }
 0x135   : > { %1148 = vmatprep.subr.bf16.mxu1 %v2687_v49 }
 0x138   : > { %1149 = vmatpush1.bf16.msra.mxu1 %v2685_v50 }
 0x139   : > { %1150 = vmatprep.subr.bf16.mxu1 %v2690_v11 }
 0x13c   : > { %1151 = vmatpush1.bf16.msra.mxu1 %v2688_v51 }
 0x13d   : > { %1152 = vmatprep.subr.bf16.mxu1 %v2693_v53 }
 0x140   : > { %1153 = vmatpush1.bf16.msra.mxu1 %v2691_v55 }
 0x141   : > { %1154 = vmatprep.subr.bf16.mxu1 %v2696_v57 }
 0x144   : > { %1155 = vmatpush1.bf16.msra.mxu1 %v2694_v61  ;;  %v2761_v61 = vld [vmem:[%s3354_s18 + $0x180] ss:$12 sps:$4 sm:$0xff]  }
 0x145   : > { %2380 = vmatprep.subr.bf16.mxu1 %v2724_v63  ;;  %v2766_v63 = vld [vmem:[%s3354_s18 + $0x19c] ss:$12 sps:$4 sm:$0xff]  }
 0x147   : > { %1173 = vmatmul.mubr.bf16.vlgmr.msra.gmra.mrb[4].mxu1 %v3400_v44  ;;  %v2738_v44 = vld [vmem:[%s3354_s18 + $0x10c] ss:$12 sps:$4 sm:$0xff]  }
 0x148   : > { %2381 = vmatpush3.bf16.msra.mxu1 %v2725_v1  ;;  %1863 = vmatprep.subr.bf16.mxu0 %v2738_v44  ;;  %v2764_v1 = vld [vmem:[%s3354_s18 + $0x198] ss:$12 sps:$4 sm:$0xff]   ;;  %v2804_v44 = vld [vmem:[%s3354_s18 + $0x1d0] ss:$12 sps:$4 sm:$0xff]  }
 0x149   : > { %2382 = vmatprep.subr.bf16.mxu1 %v2729_v3  ;;  %1864 = vmatpush1.bf16.msra.mxu0 %v2736_v12  ;;  %v2769_v3 = vld [vmem:[%s3354_s18 + $0x1b4] ss:$12 sps:$4 sm:$0xff]  }
 0x14a   : > { %1865 = vmatprep.subr.bf16.mxu0 %v2743_v14  ;;  %v2805_v12 = vld [vmem:[%s3354_s18 + $0x2a8] ss:$12 sps:$4 sm:$0xff]  }
 0x14b   : > { %v2809_v14 = vld [vmem:[%s3354_s18 + $0x1e8] ss:$12 sps:$4 sm:$0xff]  }
 0x14c   : > { %2383 = vmatpush3.bf16.msra.mxu1 %v2730_v5  ;;  %v2767_v5 = vld [vmem:[%s3354_s18 + $0x1b0] ss:$12 sps:$4 sm:$0xff]  }
 0x14d   : > { %2384 = vmatprep.subr.bf16.mxu1 %v2734_v7  ;;  %1866 = vmatpush1.bf16.msra.mxu0 %v2741_v16  ;;  %v2772_v7 = vld [vmem:[%s3354_s18 + $0x1cc] ss:$12 sps:$4 sm:$0xff]  }
 0x14e   : > { %1867 = vmatprep.subr.bf16.mxu0 %v2748_v18  ;;  %v2810_v16 = vld [vmem:[%s3354_s18 + $0x2c0] ss:$12 sps:$4 sm:$0xff]  }
 0x14f   : > { %v2814_v18 = vld [vmem:[%s3354_s18 + $0x200] ss:$12 sps:$4 sm:$0xff]  }
 0x150   : > { %2385 = vmatpush3.bf16.msra.mxu1 %v2735_v9  ;;  %v2770_v9 = vld [vmem:[%s3354_s18 + $0x1c8] ss:$12 sps:$4 sm:$0xff]  }
 0x151   : > { %2386 = vmatprep.subr.bf16.mxu1 %v2739_v10  ;;  %1868 = vmatpush1.bf16.msra.mxu0 %v2746_v19  ;;  %v2775_v10 = vld [vmem:[%s3354_s18 + $0x1e4] ss:$12 sps:$4 sm:$0xff]   ;;  %v2781_v19 = vld [vmem:[%s3354_s18 + $0x214] ss:$12 sps:$4 sm:$0xff]  }
 0x152   : > { %1869 = vmatprep.subr.bf16.mxu0 %v2753_v22  ;;  %v2819_v22 = vld [vmem:[%s3354_s18 + $0x218] ss:$12 sps:$4 sm:$0xff]  }
 0x154   : > { %2387 = vmatpush3.bf16.msra.mxu1 %v2740_v13  ;;  %v2773_v13 = vld [vmem:[%s3354_s18 + $0x1e0] ss:$12 sps:$4 sm:$0xff]  }
 0x155   : > { %2388 = vmatprep.subr.bf16.mxu1 %v2744_v15  ;;  %1870 = vmatpush1.bf16.msra.mxu0 %v2751_v23  ;;  %v2778_v15 = vld [vmem:[%s3354_s18 + $0x1fc] ss:$12 sps:$4 sm:$0xff]   ;;  %v2784_v23 = vld [vmem:[%s3354_s18 + $0x22c] ss:$12 sps:$4 sm:$0xff]  }
 0x156   : > { %1871 = vmatprep.subr.bf16.mxu0 %v2758_v26  ;;  %v2824_v26 = vld [vmem:[%s3354_s18 + $0x230] ss:$12 sps:$4 sm:$0xff]  }
 0x158   : > { %2389 = vmatpush3.bf16.msra.mxu1 %v2745_v17  ;;  %v2776_v17 = vld [vmem:[%s3354_s18 + $0x1f8] ss:$12 sps:$4 sm:$0xff]  }
 0x159   : > { %2390 = vmatprep.subr.bf16.mxu1 %v2749_v20  ;;  %1872 = vmatpush1.bf16.msra.mxu0 %v2756_v27  ;;  %v2815_v20 = vld [vmem:[%s3354_s18 + $0x2d8] ss:$12 sps:$4 sm:$0xff]  }
 0x15a   : > { %1884 = vmatprep.subr.bf16.mxu0 %v2763_v30  ;;  %v2788_v27 = vld [vmem:[%s3354_s18 + $0x244] ss:$12 sps:$4 sm:$0xff]  }
 0x15b   : > { %v2791_v30 = vld [vmem:[%s3354_s18 + $0x258] ss:$12 sps:$4 sm:$0xff]  }
 0x15c   : > { %2391 = vmatpush3.bf16.msra.mxu1 %v2750_v21  ;;  %v2779_v21 = vld [vmem:[%s3354_s18 + $0x210] ss:$12 sps:$4 sm:$0xff]  }
 0x15d   : > { %2392 = vmatprep.subr.bf16.mxu1 %v2754_v24  ;;  %v2820_v24 = vld [vmem:[%s3354_s18 + $0x2f0] ss:$12 sps:$4 sm:$0xff]  }
 0x160   : > { %2393 = vmatpush3.bf16.msra.mxu1 %v2755_v25  ;;  %v2782_v25 = vld [vmem:[%s3354_s18 + $0x228] ss:$12 sps:$4 sm:$0xff]  }
 0x161   : > { %2394 = vmatprep.subr.bf16.mxu1 %v2759_v28  ;;  %v2786_v28 = vld [vmem:[%s3354_s18 + $0x240] ss:$12 sps:$4 sm:$0xff]  }
 0x164   : > { %2395 = vmatpush3.bf16.msra.mxu1 %v2760_v29  ;;  %v2793_v29 = vld [vmem:[%s3354_s18 + $0x25c] ss:$12 sps:$4 sm:$0xff]  }
 0x165   : > { %2402 = vmatprep.subr.bf16.mxu1 %v2785_v31  ;;  %v2798_v31 = vld [vmem:[%s3354_s18 + $0x274] ss:$12 sps:$4 sm:$0xff]  }
 0x1ba   : > { %v1088_v32 = vpop.f32.mrb[0].mxu1 }
 0x1bb   : > { %v1090_v33 = vpop.f32.mrb[1].mxu1 }
 0x1bc   : > { %v1092_v34 = vpop.f32.mrb[2].mxu1 }
 0x1bd   : > { %v1094_v35 = vpop.f32.mrb[3].mxu1 }
 0x1d9   : > { %v1045_v43 = vpop.f32.mrb[0].mxu0 }
 0x1da   : > { %v1046_v45 = vadd.f32 %v1045_v43, %v498_v41  ;;  %v1047_v46 = vpop.f32.mrb[1].mxu0  ;;  %v2811_v43 = vld [vmem:[%s3354_s18 + $0x2b8] ss:$12 sps:$4 sm:$0xff]  }
 0x1db   : > { %v1048_v47 = vadd.f32 %v1047_v46, %v502_v42  ;;  %v1049_v48 = vpop.f32.mrb[2].mxu0  ;;  %v2818_v46 = vld [vmem:[%s3354_s18 + $0x2d4] ss:$12 sps:$4 sm:$0xff]  }
 0x1dc   : > { %v1089_v49 = vadd.f32 %v1088_v32, %v1046_v45  ;;  %v1050_v50 = vadd.f32 %v1049_v48, %v498_v41  ;;  %v1051_v11 = vpop.f32.mrb[3].mxu0  ;;  %v2796_v32 = vld [vmem:[%s3354_s18 + $0x270] ss:$12 sps:$4 sm:$0xff]   ;;  %v510_v45 = vrot.slane %v3522_v39, %v509_v40 }
 0x1dd   : > { %v1091_v51 = vadd.f32 %v1090_v33, %v1048_v47  ;;  %v1052_v52 = vadd.f32 %v1051_v11, %v502_v42  ;;  %v2803_v33 = vld [vmem:[%s3354_s18 + $0x28c] ss:$12 sps:$4 sm:$0xff]   ;;  %v2813_v41 = vld [vmem:[%s3354_s18 + $0x2bc] ss:$12 sps:$4 sm:$0xff]   ;;  %v506_v42 = vrot.slane %v3522_v39, %v505_v36 }
 0x1de   : > { %v1093_v53 = vadd.f32 %v1092_v34, %v1050_v50  ;;  %v1183_v55 = vmax.f32 %v1089_v49, 0.0  ;;  %v2801_v34 = vld [vmem:[%s3354_s18 + $0x288] ss:$12 sps:$4 sm:$0xff]  }
 0x1df   : > { %v1095_v54 = vadd.f32 %v1094_v35, %v1052_v52  ;;  %v1184_v57 = vmax.f32 %v1091_v51, 0.0  ;;  %v2808_v35 = vld [vmem:[%s3354_s18 + $0x2a4] ss:$12 sps:$4 sm:$0xff]   ;;  %v2821_v39 = vld [vmem:[%s3354_s18 + $0x2e8] ss:$12 sps:$4 sm:$0xff]  }
 0x1e0   : > { %v1187_v56 = vmax.f32 %v1093_v53, 0.0  ;;  %v2816_v51 = vld [vmem:[%s3354_s18 + $0x2d0] ss:$12 sps:$4 sm:$0xff]   ;;  %v2823_v53 = vld [vmem:[%s3354_s18 + $0x2ec] ss:$12 sps:$4 sm:$0xff]  }
 0x1e1   : > { %v1188_v58 = vmax.f32 %v1095_v54, 0.0 }
 0x1e2   : > { %v1197_v59 = vpack.c.bf16 %v1187_v56, %v1183_v55 }
 0x1e3   : > { %v1198_v60 = vpack.c.bf16 %v1188_v58, %v1184_v57 }
 0x1e5   : > { %1873 = vmatprep.mubr.bf16.mxu0 %v1198_v60  ;;  %1959 = vmatprep.mubr.bf16.mxu1 %v1198_v60 }
 0x1e6   : > { %1874 = vmatmul.mubr.bf16.vlgmr.msra.gmra.mrb[4].mxu0 %v1197_v59  ;;  %1960 = vmatmul.mubr.bf16.vlgmr.msra.gmra.mrb[8].mxu1 %v1197_v59 }
 0x1e7   : > { %1885 = vmatpush1.bf16.msra.mxu0 %v2761_v61  ;;  %2403 = vmatpush3.bf16.msra.mxu1 %v2789_v62 }
 0x1e8   : > { %1886 = vmatprep.subr.bf16.mxu0 %v2766_v63  ;;  %2404 = vmatprep.subr.bf16.mxu1 %v2790_v0 }
 0x1eb   : > { %1887 = vmatpush1.bf16.msra.mxu0 %v2764_v1  ;;  %2405 = vmatpush3.bf16.msra.mxu1 %v2794_v2 }
 0x1ec   : > { %1888 = vmatprep.subr.bf16.mxu0 %v2769_v3  ;;  %2406 = vmatprep.subr.bf16.mxu1 %v2795_v4  ;;  %v1191_v3 = vld [vmem:[#allocation11] sm:$0xff] }
 0x1ef   : > { %1889 = vmatpush1.bf16.msra.mxu0 %v2767_v5  ;;  %2407 = vmatpush3.bf16.msra.mxu1 %v2799_v6  ;;  %v1192_v5 = vld [vmem:[#allocation11 + $0x8] sm:$0xff] }
 0x1f0   : > { %1890 = vmatprep.subr.bf16.mxu0 %v2772_v7  ;;  %2408 = vmatprep.subr.bf16.mxu1 %v2800_v8  ;;  %v1194_v8 = vld [vmem:[#allocation11 + $0x18] sm:$0xff] }
 0x1f3   : > { %1891 = vmatpush1.bf16.msra.mxu0 %v2770_v9  ;;  %2409 = vmatpush3.bf16.msra.mxu1 %v2804_v44 }
 0x1f4   : > { %1892 = vmatprep.subr.bf16.mxu0 %v2775_v10  ;;  %2410 = vmatprep.subr.bf16.mxu1 %v2805_v12 }
 0x1f7   : > { %1893 = vmatpush1.bf16.msra.mxu0 %v2773_v13  ;;  %2411 = vmatpush3.bf16.msra.mxu1 %v2809_v14  ;;  %v1195_v13 = vld [vmem:[#allocation11 + $0x20] sm:$0xff]  ;;  %v1193_v14 = vld [vmem:[#allocation11 + $0x10] sm:$0xff] }
 0x1f8   : > { %1894 = vmatprep.subr.bf16.mxu0 %v2778_v15  ;;  %2412 = vmatprep.subr.bf16.mxu1 %v2810_v16 }
 0x1fb   : > { %1895 = vmatpush1.bf16.msra.mxu0 %v2776_v17  ;;  %2413 = vmatpush3.bf16.msra.mxu1 %v2814_v18 }
 0x1fc   : > { %1896 = vmatprep.subr.bf16.mxu0 %v2781_v19  ;;  %2414 = vmatprep.subr.bf16.mxu1 %v2815_v20 }
 0x1ff   : > { %1897 = vmatpush1.bf16.msra.mxu0 %v2779_v21  ;;  %2415 = vmatpush3.bf16.msra.mxu1 %v2819_v22  ;;  %v1196_v22 = vld [vmem:[#allocation11 + $0x28] sm:$0xff] }
 0x200   : > { %1898 = vmatprep.subr.bf16.mxu0 %v2784_v23  ;;  %2416 = vmatprep.subr.bf16.mxu1 %v2820_v24 }
 0x203   : > { %1899 = vmatpush1.bf16.msra.mxu0 %v2782_v25  ;;  %2417 = vmatpush3.bf16.msra.mxu1 %v2824_v26 }
 0x204   : > { %1900 = vmatprep.subr.bf16.mxu0 %v2788_v27 }
 0x207   : > { %1901 = vmatpush1.bf16.msra.mxu0 %v2786_v28 }
 0x208   : > { %1902 = vmatprep.subr.bf16.mxu0 %v2793_v29 }
 0x20b   : > { %1903 = vmatpush1.bf16.msra.mxu0 %v2791_v30 }
 0x20c   : > { %1904 = vmatprep.subr.bf16.mxu0 %v2798_v31 }
 0x20f   : > { %1905 = vmatpush1.bf16.msra.mxu0 %v2796_v32 }
 0x210   : > { %1906 = vmatprep.subr.bf16.mxu0 %v2803_v33 }
 0x213   : > { %1907 = vmatpush1.bf16.msra.mxu0 %v2801_v34 }
 0x214   : > { %1908 = vmatprep.subr.bf16.mxu0 %v2808_v35 }
 0x217   : > { %1909 = vmatpush1.bf16.msra.mxu0 %v2806_v38 }
 0x218   : > { %1910 = vmatprep.subr.bf16.mxu0 %v2813_v41 }
 0x21a   : > { %v1174_v47 = vpop.f32.mrb[4].mxu1 }
 0x21b   : > { %v2432_v48 = vadd.f32 %v1174_v47, %v506_v42  ;;  %v1176_v49 = vpop.f32.mrb[5].mxu1  ;;  %1911 = vmatpush1.bf16.msra.mxu0 %v2811_v43 }
 0x21c   : > { %v2433_v50 = vadd.f32 %v1176_v49, %v510_v45  ;;  %v1178_v11 = vpop.f32.mrb[6].mxu1  ;;  %1912 = vmatprep.subr.bf16.mxu0 %v2818_v46 }
 0x21d   : > { %v2434_v37 = vadd.f32 %v1178_v11, %v506_v42  ;;  %v1180_v52 = vpop.f32.mrb[7].mxu1  ;;  %v1185_v55 = vmax.f32 %v2432_v48, 0.0 }
 0x21e   : > { %v2435_v54 = vadd.f32 %v1180_v52, %v510_v45  ;;  %v1186_v57 = vmax.f32 %v2433_v50, 0.0 }
 0x21f   : > { %v1189_v56 = vmax.f32 %v2434_v37, 0.0  ;;  %1913 = vmatpush1.bf16.msra.mxu0 %v2816_v51 }
 0x220   : > { %v1190_v58 = vmax.f32 %v2435_v54, 0.0  ;;  %1914 = vmatprep.subr.bf16.mxu0 %v2823_v53 }
 0x221   : > { %v1199_v59 = vpack.c.bf16 %v1189_v56, %v1185_v55 }
 0x222   : > { %v1200_v60 = vpack.c.bf16 %v1190_v58, %v1186_v57 }
 0x223   : > { %1915 = vmatpush1.bf16.msra.mxu0 %v2821_v39 }
 0x224   : > { %1916 = vmatprep.mubr.bf16.mxu0 %v1200_v60  ;;  %2000 = vmatprep.mubr.bf16.mxu1 %v1200_v60 }
 0x225   : > { %2001 = vmatmul.mubr.bf16.vlgmr.msra.gmra.mrb[12].mxu1 %v1199_v59 }
 0x226   : > { %1917 = vmatmul.mubr.bf16.vlgmr.msra.gmra.mrb[4].mxu0 %v1199_v59 }
 0x2b9   : > { %v2396_v61 = vpop.f32.mrb[8].mxu1 }
 0x2ba   : > { %v2397_v62 = vpop.f32.mrb[9].mxu1 }
 0x2bb   : > { %v2398_v63 = vadd.f32 %v2397_v62, %v2396_v61  ;;  %v2399_v0 = vpop.f32.mrb[10].mxu1 }
 0x2bc   : > { %v2400_v1 = vpop.f32.mrb[11].mxu1 }
 0x2bd   : > { %v2401_v2 = vadd.f32 %v2400_v1, %v2399_v0 }
 0x2f8   : > { %v2418_v4 = vpop.f32.mrb[12].mxu1 }
 0x2f9   : > { %v1918_v6 = vpop.f32.mrb[4].mxu0  ;;  %v2419_v7 = vpop.f32.mrb[13].mxu1 }
 0x2fa   : > { %v2009_v9 = vadd.f32 %v1918_v6, %v1191_v3  ;;  %v2420_v44 = vadd.f32 %v2419_v7, %v2418_v4  ;;  %v1920_v10 = vpop.f32.mrb[5].mxu0  ;;  %v2421_v12 = vpop.f32.mrb[14].mxu1 }
 0x2fb   : > { %v2010_v15 = vadd.f32 %v1920_v10, %v1192_v5  ;;  %v1922_v16 = vpop.f32.mrb[6].mxu0  ;;  %v2422_v17 = vpop.f32.mrb[15].mxu1 }
 0x2fc   : > { %2015 = vst [vmem:[#allocation11] sm:$0xff] %v2009_v9  ;;  %v2003_v18 = vadd.f32 %v2420_v44, %v2398_v63  ;;  %v2012_v19 = vadd.f32 %v1922_v16, %v1194_v8  ;;  %v2423_v20 = vadd.f32 %v2422_v17, %v2421_v12  ;;  %v1924_v21 = vpop.f32.mrb[7].mxu0 }
 0x2fd   : > { %2016 = vst [vmem:[#allocation11 + $0x8] sm:$0xff] %v2010_v15  ;;  %v2013_v23 = vadd.f32 %v1924_v21, %v1195_v13 }
 0x2fe   : > { %v2011_v24 = vadd.f32 %v2003_v18, %v1193_v14  ;;  %2018 = vst [vmem:[#allocation11 + $0x18] sm:$0xff] %v2012_v19  ;;  %v2006_v25 = vadd.f32 %v2423_v20, %v2401_v2 }
 0x2ff   : > { %2019 = vst [vmem:[#allocation11 + $0x20] sm:$0xff] %v2013_v23 }
 0x300   : > { %2017 = vst [vmem:[#allocation11 + $0x10] sm:$0xff] %v2011_v24  ;;  %v2014_v26 = vadd.f32 %v2006_v25, %v1196_v22 }
 0x302   : > { %2020 = vst [vmem:[#allocation11 + $0x28] sm:$0xff] %v2014_v26 }
 0x303   : > { %2984 = shalt.err (!%p2981_p13)
}
 0x304   : > { %s3666_s17 = sld [smem:[#allocation22_spill]] }
 0x30a   : > { %s2985_s16 = scalar_lea.hbm %s3666_s17, 768 }
 0x30b   : > { %p2986_p3 = scmp.ne.s32.totalorder %s3666_s17, %s2985_s16  ;;  %p2991_p9 = scmp.lt.u32.totalorder %s2985_s16, %s3666_s17 }
 0x30d   : > { %p2987_p1 = pnand %p2986_p3, %p2488_p12 }
 0x30f   : > { %p2988_p4 = pneg %p2987_p1 }
 0x311   : > { %p2993_p5 = pnand %p2991_p9, %p2988_p4 }
 0x313   : > { %2996 = shalt.err (!%p2993_p5)
}
 0x314   : > { %s3077_s28 = smov 384   ;;  %s3078_s13 = smov 24  }
 0x315   : > { %2463 = dma.vmem_to_hbm [thread:$0]  (%p2488_p12), %s2032_s30, 768, %s3666_s17, [#allocation4], %s3077_s28, %s3077_s28, %s3078_s13  }
 0x316   : > { %3038 = dma.done.wait (%p2488_p12), [#allocation4], 768  }
 0x317   : > { %3040 = vsyncadd (%p2488_p12), [#allocation4], 4294966528 }
 0x318 PF: > { %s23_s23 = sadd.s32 1, %s3063_s23   ;;  %s3667_s15 = sld [smem:[#allocation19_spill]] }
 0x319   : > { %p20_p2 = scmp.ge.s32.totalorder %s23_s23, 5   ;;  %s3668_s6 = sld [smem:[#allocation18_spill]] }
 0x31a   : > { %s3669_s18 = smov %s3047_s19  ;;  %s3670_s19 = smov %s3051_s20 }
 0x31b   : > { %s3672_s21 = smov %s3059_s22  ;;  %22 = sbr.rel (!%p20_p2) target bundleno = 12 (0xc), region = 116 }
 0x31e   : > { %s3671_s20 = smov %s3667_s15 }
 0x31f   : > { %s3673_s22 = smov %s3668_s6 }
 0x322   :  { %2047 = vsyncpa [#allocation3], 1 }
 0x323   :  { %2049 = vsyncpa [#allocation3 + $0x1], 1 }
 0x324   :  { %2050 = vsyncpa [#allocation6], 1 }
 0x325   :  { %2052 = vsyncpa [#allocation6 + $0x1], 1 }
 0x326   :  { %2053 = vsyncpa [#allocation9], 1 }
 0x327   :  { %2055 = vsyncpa [#allocation9 + $0x1], 1 }
 0x328   :  { %2056 = vsyncpa [#allocation4], 1 }
 0x329   :  { %2058 = vsyncpa [#allocation4 + $0x1], 1 }

</bundles_post_ra>
